<compile_context>
chip_gen: v6e
topology: v6e:2x2x1
jax: 0.10.0
libtpu: 0.0.40
codegen_flags: <defaults>
</compile_context>

<pallas_src>
import functools

import jax
import jax.numpy as jnp
from jax.experimental import pallas as pl
from jax.experimental.pallas import tpu as pltpu


def _bblock_kernel(x_ref, w_ref, b_ref, o_ref, *,
                   SH, W, Wp, KH, KW, C_in, C_out, res_scale):
    """One (batch, strip) tile per grid step.

    x_ref: (1, 1, C_in, SHp*Wp + KW-1) bf16 pre-padded strip (+halo),
           channel-major, padded (rows, cols) flattened into the lane axis.
    w_ref: (KH, C_out, KW*C_in)        bf16 weights, resident across the grid.
    b_ref: (C_out, 1)                  f32 bias.
    o_ref: (1, C_out, SH*W)            output strip, channel-major, lane-dense.
    """
    Mc = SH * Wp                     # matmul N dim: all padded cols of SH rows
    xf = x_ref[0, 0]                 # (C_in, Lp)

    acc = jnp.zeros((C_out, Mc), jnp.float32)
    for kh in range(KH):             # KH accumulating MXU matmuls, K = KW*C_in
        base = kh * Wp
        # Taps are pure lane-offset slices of the flattened strip; the concat
        # stacks them along sublanes at C_in-multiple offsets (row order kw,ci
        # matches the weight layout below).
        taps = [xf[:, base + kw: base + kw + Mc] for kw in range(KW)]
        p = jnp.concatenate(taps, axis=0)          # (KW*C_in, Mc)
        acc = acc + jnp.dot(w_ref[kh], p, preferred_element_type=jnp.float32)

    acc = acc + b_ref[...]           # (C_out, 1) broadcast over lanes
    acc = jnp.maximum(acc, 0.0)      # ReLU
    if res_scale != 1.0:             # only when res_scale <= 0 (not folded)
        acc = acc * res_scale
    acc = acc.astype(o_ref.dtype)

    # Compact the Wp-strided columns to W-strided output rows. (The Wp-W
    # garbage columns per row fall out of the im2col-over-padded-rows trick.)
    for r in range(SH):
        o_ref[0, :, r * W:(r + 1) * W] = acc[:, r * Wp: r * Wp + W]


def _pick_strip_rows(H, W, C_in, C_out, KH, KW, *, vmem_budget_bytes=8 << 20):
    """Largest divisor of H whose per-step working set fits the budget,
    preferring strip_rows*W % 128 == 0 (unmasked, lane-dense output stores)."""
    def footprint(sh):
        shp, wp = sh + KH - 1, W + KW - 1
        x_blk = C_in * (shp * wp + KW - 1) * 2      # bf16 strip block
        patch = KW * C_in * sh * wp * 2             # one kh-patch (bf16)
        acc = C_out * sh * wp * 4                   # f32 accumulator
        o_blk = C_out * sh * W * 4                  # output block
        return 2 * (x_blk + o_blk) + patch + acc    # double-buffered I/O
    divs = [d for d in range(H, 0, -1) if H % d == 0]
    for require_lane_dense in (True, False):
        for d in divs:
            if require_lane_dense and (d * W) % 128 != 0:
                continue
            if footprint(d) <= vmem_budget_bytes:
                return d
    return 1  # TODO(synk): pad H rather than degrade to 1-row strips.


def bblock_forward(x_nchw, weight_oihw, bias, *, res_scale=1.0,
                   strip_rows=None, out_dtype=jnp.float32):
    """Forward pass equivalent to BBlock(conv, Cin, Cout, K).forward(x)."""
    N, C_in, H, W = x_nchw.shape
    C_out, C_in_w, KH, KW = weight_oihw.shape
    assert C_in_w == C_in
    assert KH % 2 == 1 and KW % 2 == 1, "padding = k // 2 assumes odd kernel"
    ph, pw = KH // 2, KW // 2
    Wp = W + 2 * pw

    if strip_rows is None:
        strip_rows = _pick_strip_rows(H, W, C_in, C_out, KH, KW)
    SH = int(strip_rows)
    assert H % SH == 0, "strip_rows must divide H"
    S = H // SH
    SHp = SH + 2 * ph
    Lp = SHp * Wp + (KW - 1)

    # Fold res_scale into conv params when legal (ReLU(s*x) == s*ReLU(x), s>0).
    # NOTE: res_scale must remain a static Python number for this branch.
    if res_scale > 0:
        w_eff = weight_oihw * res_scale
        b_eff = bias * res_scale
        kernel_scale = 1.0
    else:
        w_eff, b_eff, kernel_scale = weight_oihw, bias, float(res_scale)

    # --- Wrapper-side data prep (one fused pass over the input) -------------
    # Pad H/W, cut overlapping strips (each with its (KH-1)-row halo), flatten
    # the padded spatial axes, append KW-1 trailing zeros (so the last row's
    # garbage tap reads stay in bounds) and cast to bf16. Duplication cost is
    # only 2*ph/strip_rows of the input; in exchange the strips are plain
    # Blocked blocks, so BlockSpec double-buffering overlaps DMA with compute.
    xp = jnp.pad(x_nchw, ((0, 0), (0, 0), (ph, ph), (pw, pw)))
    xs = jnp.stack([xp[:, :, s * SH: s * SH + SHp, :] for s in range(S)],
                   axis=1)                              # (N, S, C_in, SHp, Wp)
    xs = xs.reshape(N, S, C_in, SHp * Wp)
    xs = jnp.pad(xs, ((0, 0), (0, 0), (0, 0), (0, KW - 1)))
    xs = xs.astype(jnp.bfloat16)                        # (N, S, C_in, Lp)

    # OIHW -> (KH, C_out, KW*C_in): w_t[kh] is the (M, K) matmul LHS whose
    # column order (kw, ci) matches the in-kernel patch row order.
    w_t = jnp.transpose(w_eff, (2, 0, 3, 1)).reshape(KH, C_out, KW * C_in)
    w_t = w_t.astype(jnp.bfloat16)
    b2d = b_eff.reshape(C_out, 1).astype(jnp.float32)

    kernel = functools.partial(
        _bblock_kernel, SH=SH, W=W, Wp=Wp, KH=KH, KW=KW,
        C_in=C_in, C_out=C_out, res_scale=kernel_scale)

    flops = 2 * N * H * W * C_out * KH * KW * C_in
    bytes_accessed = (xs.size * 2 + w_t.size * 2 + b2d.size * 4
                      + N * C_out * H * W * jnp.dtype(out_dtype).itemsize)

    out = pl.pallas_call(
        kernel,
        out_shape=jax.ShapeDtypeStruct((N, C_out, H * W), out_dtype),
        grid_spec=pltpu.PrefetchScalarGridSpec(
            num_scalar_prefetch=0,
            grid=(N, S),
            in_specs=[
                pl.BlockSpec((1, 1, C_in, Lp), lambda n, s: (n, s, 0, 0)),
                # Weights/bias: index maps ignore (n, s) -> resident, one DMA.
                pl.BlockSpec((KH, C_out, KW * C_in), lambda n, s: (0, 0, 0)),
                pl.BlockSpec((C_out, 1), lambda n, s: (0, 0)),
            ],
            out_specs=pl.BlockSpec((1, C_out, SH * W), lambda n, s: (n, 0, s)),
        ),
        compiler_params=pltpu.CompilerParams(
            dimension_semantics=("parallel", "parallel"),
            # Above the 16/32 MiB scoped defaults, below every generation's
            # physical VMEM (incl. v7x's 64 MiB/TC).
            vmem_limit_bytes=48 * 1024 * 1024),
        cost_estimate=pl.CostEstimate(
            flops=flops, transcendentals=0, bytes_accessed=bytes_accessed),
    )(xs, w_t, b2d)

    # Channel-major, lane-dense kernel output -> NCHW is a free reshape.
    return out.reshape(N, C_out, H, W)


def _reference_forward(x_nchw, weight_oihw, bias, *, res_scale=1.0):
    """Pure-JAX f32 reference (lax conv) for a correctness sanity check."""
    KH, KW = weight_oihw.shape[2], weight_oihw.shape[3]
    y = jax.lax.conv_general_dilated(
        x_nchw.astype(jnp.float32), weight_oihw.astype(jnp.float32),
        window_strides=(1, 1),
        padding=[(KH // 2, KH // 2), (KW // 2, KW // 2)],
        dimension_numbers=("NCHW", "OIHW", "NCHW"))
    y = y + bias.reshape(1, -1, 1, 1)
    return jnp.maximum(y, 0.0) * res_scale


if __name__ == "__main__":
    # Small shapes consistent with the module: batch=2, in_ch=4, out_ch=8,
    # spatial=16x16, kernel_size=3, bias=True, bn=False, act=ReLU, res_scale=1.
    N, C_in, C_out, H, W, K = 2, 4, 8, 16, 16, 3
    res_scale = 1.0

    key = jax.random.PRNGKey(0)
    kx, kw_, kb = jax.random.split(key, 3)
    x = jax.random.normal(kx, (N, C_in, H, W), dtype=jnp.float32)
    fan_in = C_in * K * K
    weight = jax.random.normal(
        kw_, (C_out, C_in, K, K), dtype=jnp.float32) / jnp.sqrt(fan_in)
    bias = jax.random.normal(kb, (C_out,), dtype=jnp.float32) * 0.1

    # strip_rows=8 -> 2 strips per image so the strip/halo path is exercised
    # (and strip*W = 128 keeps the output store lane-dense). Production sizes
    # should rely on the auto picker (strip_rows=None).
    fwd = jax.jit(functools.partial(
        bblock_forward, res_scale=res_scale, strip_rows=8))
    out = jax.block_until_ready(fwd(x, weight, bias))
    ref = jax.block_until_ready(
        _reference_forward(x, weight, bias, res_scale=res_scale))

    assert out.shape == (N, C_out, H, W)
    # bf16 activations/weights with f32 accumulation: bf16-level tolerance.
    assert jnp.allclose(out, ref, atol=3e-2, rtol=3e-2), "mismatch vs reference"

    print("KERNEL_OK")
</pallas_src>

<mosaic_0001>
module attributes {stable_mosaic.version = 11 : i64} {
  func.func @_bblock_kernel(%arg0: i32, %arg1: i32, %arg2: memref<1x1x4x182xbf16, #tpu.memory_space<vmem>>, %arg3: memref<3x8x12xbf16, #tpu.memory_space<vmem>>, %arg4: memref<8x1xf32, #tpu.memory_space<vmem>>, %arg5: memref<1x8x128xf32, #tpu.memory_space<vmem>>) attributes {dimension_semantics = [#tpu.dimension_semantics<parallel>, #tpu.dimension_semantics<parallel>], iteration_bounds = array<i64: 2, 2>, scalar_prefetch = 0 : i64, scratch_operands = 0 : i64, tpu.core_type = #tpu.core_type<tc>, window_params = [{transform_indices = @transform_0, window_bounds = array<i64: 1, 1, 4, 182>}, {pipeline_mode = #tpu.pipeline_mode<synchronous>, transform_indices = @transform_1, window_bounds = array<i64: 3, 8, 12>}, {pipeline_mode = #tpu.pipeline_mode<synchronous>, transform_indices = @transform_2, window_bounds = array<i64: 8, 1>}, {transform_indices = @transform_3, window_bounds = array<i64: 1, 8, 128>}]} {
    %c0 = arith.constant 0 : index
    %c0_0 = arith.constant 0 : index
    %c0_1 = arith.constant 0 : index
    %c0_2 = arith.constant 0 : index
    %0 = vector.load %arg2[%c0, %c0_0, %c0_1, %c0_2] : memref<1x1x4x182xbf16, #tpu.memory_space<vmem>>, vector<1x1x4x182xbf16>
    %1 = vector.shape_cast %0 : vector<1x1x4x182xbf16> to vector<4x182xbf16>
    %cst = arith.constant 0.000000e+00 : f32
    %2 = vector.broadcast %cst : f32 to vector<8x144xf32>
    %3 = vector.extract_strided_slice %1 {offsets = [0, 0], sizes = [4, 144], strides = [1, 1]} : vector<4x182xbf16> to vector<4x144xbf16>
    %4 = vector.extract_strided_slice %1 {offsets = [0, 1], sizes = [4, 144], strides = [1, 1]} : vector<4x182xbf16> to vector<4x144xbf16>
    %5 = vector.extract_strided_slice %1 {offsets = [0, 2], sizes = [4, 144], strides = [1, 1]} : vector<4x182xbf16> to vector<4x144xbf16>
    %6 = tpu.concatenate %3, %4, %5 in 0 : vector<4x144xbf16>, vector<4x144xbf16>, vector<4x144xbf16> -> vector<12x144xbf16>
    %c0_3 = arith.constant 0 : index
    %c0_4 = arith.constant 0 : index
    %c0_5 = arith.constant 0 : index
    %7 = vector.load %arg3[%c0_3, %c0_4, %c0_5] : memref<3x8x12xbf16, #tpu.memory_space<vmem>>, vector<1x8x12xbf16>
    %8 = vector.shape_cast %7 : vector<1x8x12xbf16> to vector<8x12xbf16>
    %cst_6 = arith.constant dense<0.000000e+00> : vector<8x144xf32>
    %9 = tpu.matmul %8, %6, %cst_6 {dimension_numbers = #tpu.dot_dimension_numbers<[1], [0], [0], [1], [0, 0, 1, 1], [], []>} : vector<8x12xbf16>, vector<12x144xbf16>, vector<8x144xf32> -> vector<8x144xf32>
    %10 = arith.addf %2, %9 : vector<8x144xf32>
    %11 = vector.extract_strided_slice %1 {offsets = [0, 18], sizes = [4, 144], strides = [1, 1]} : vector<4x182xbf16> to vector<4x144xbf16>
    %12 = vector.extract_strided_slice %1 {offsets = [0, 19], sizes = [4, 144], strides = [1, 1]} : vector<4x182xbf16> to vector<4x144xbf16>
    %13 = vector.extract_strided_slice %1 {offsets = [0, 20], sizes = [4, 144], strides = [1, 1]} : vector<4x182xbf16> to vector<4x144xbf16>
    %14 = tpu.concatenate %11, %12, %13 in 0 : vector<4x144xbf16>, vector<4x144xbf16>, vector<4x144xbf16> -> vector<12x144xbf16>
    %c1 = arith.constant 1 : index
    %c0_7 = arith.constant 0 : index
    %c0_8 = arith.constant 0 : index
    %15 = vector.load %arg3[%c1, %c0_7, %c0_8] : memref<3x8x12xbf16, #tpu.memory_space<vmem>>, vector<1x8x12xbf16>
    %16 = vector.shape_cast %15 : vector<1x8x12xbf16> to vector<8x12xbf16>
    %cst_9 = arith.constant dense<0.000000e+00> : vector<8x144xf32>
    %17 = tpu.matmul %16, %14, %cst_9 {dimension_numbers = #tpu.dot_dimension_numbers<[1], [0], [0], [1], [0, 0, 1, 1], [], []>} : vector<8x12xbf16>, vector<12x144xbf16>, vector<8x144xf32> -> vector<8x144xf32>
    %18 = arith.addf %10, %17 : vector<8x144xf32>
    %19 = vector.extract_strided_slice %1 {offsets = [0, 36], sizes = [4, 144], strides = [1, 1]} : vector<4x182xbf16> to vector<4x144xbf16>
    %20 = vector.extract_strided_slice %1 {offsets = [0, 37], sizes = [4, 144], strides = [1, 1]} : vector<4x182xbf16> to vector<4x144xbf16>
    %21 = vector.extract_strided_slice %1 {offsets = [0, 38], sizes = [4, 144], strides = [1, 1]} : vector<4x182xbf16> to vector<4x144xbf16>
    %22 = tpu.concatenate %19, %20, %21 in 0 : vector<4x144xbf16>, vector<4x144xbf16>, vector<4x144xbf16> -> vector<12x144xbf16>
    %c2 = arith.constant 2 : index
    %c0_10 = arith.constant 0 : index
    %c0_11 = arith.constant 0 : index
    %23 = vector.load %arg3[%c2, %c0_10, %c0_11] : memref<3x8x12xbf16, #tpu.memory_space<vmem>>, vector<1x8x12xbf16>
    %24 = vector.shape_cast %23 : vector<1x8x12xbf16> to vector<8x12xbf16>
    %cst_12 = arith.constant dense<0.000000e+00> : vector<8x144xf32>
    %25 = tpu.matmul %24, %22, %cst_12 {dimension_numbers = #tpu.dot_dimension_numbers<[1], [0], [0], [1], [0, 0, 1, 1], [], []>} : vector<8x12xbf16>, vector<12x144xbf16>, vector<8x144xf32> -> vector<8x144xf32>
    %26 = arith.addf %18, %25 : vector<8x144xf32>
    %c0_13 = arith.constant 0 : index
    %c0_14 = arith.constant 0 : index
    %27 = vector.load %arg4[%c0_13, %c0_14] : memref<8x1xf32, #tpu.memory_space<vmem>>, vector<8x1xf32>
    %28 = vector.broadcast %27 : vector<8x1xf32> to vector<8x144xf32>
    %29 = arith.addf %26, %28 : vector<8x144xf32>
    %cst_15 = arith.constant 0.000000e+00 : f32
    %30 = vector.broadcast %cst_15 : f32 to vector<8x144xf32>
    %31 = arith.maximumf %29, %30 : vector<8x144xf32>
    %32 = vector.extract_strided_slice %31 {offsets = [0, 0], sizes = [8, 16], strides = [1, 1]} : vector<8x144xf32> to vector<8x16xf32>
    %c0_16 = arith.constant 0 : index
    %c0_17 = arith.constant 0 : index
    %c0_18 = arith.constant 0 : index
    %33 = vector.load %arg5[%c0_16, %c0_17, %c0_18] : memref<1x8x128xf32, #tpu.memory_space<vmem>>, vector<1x8x16xf32>
    %34 = vector.shape_cast %33 : vector<1x8x16xf32> to vector<8x16xf32>
    %35 = vector.shape_cast %32 : vector<8x16xf32> to vector<1x8x16xf32>
    tpu.vector_store %arg5[%c0_16, %c0_17, %c0_18], %35 {strides = array<i32>} : memref<1x8x128xf32, #tpu.memory_space<vmem>>, vector<1x8x16xf32>,
    %36 = vector.extract_strided_slice %31 {offsets = [0, 18], sizes = [8, 16], strides = [1, 1]} : vector<8x144xf32> to vector<8x16xf32>
    %c0_19 = arith.constant 0 : index
    %c0_20 = arith.constant 0 : index
    %c16 = arith.constant 16 : index
    %37 = vector.load %arg5[%c0_19, %c0_20, %c16] : memref<1x8x128xf32, #tpu.memory_space<vmem>>, vector<1x8x16xf32>
    %38 = vector.shape_cast %37 : vector<1x8x16xf32> to vector<8x16xf32>
    %39 = vector.shape_cast %36 : vector<8x16xf32> to vector<1x8x16xf32>
    tpu.vector_store %arg5[%c0_19, %c0_20, %c16], %39 {strides = array<i32>} : memref<1x8x128xf32, #tpu.memory_space<vmem>>, vector<1x8x16xf32>,
    %40 = vector.extract_strided_slice %31 {offsets = [0, 36], sizes = [8, 16], strides = [1, 1]} : vector<8x144xf32> to vector<8x16xf32>
    %c0_21 = arith.constant 0 : index
    %c0_22 = arith.constant 0 : index
    %c32 = arith.constant 32 : index
    %41 = vector.load %arg5[%c0_21, %c0_22, %c32] : memref<1x8x128xf32, #tpu.memory_space<vmem>>, vector<1x8x16xf32>
    %42 = vector.shape_cast %41 : vector<1x8x16xf32> to vector<8x16xf32>
    %43 = vector.shape_cast %40 : vector<8x16xf32> to vector<1x8x16xf32>
    tpu.vector_store %arg5[%c0_21, %c0_22, %c32], %43 {strides = array<i32>} : memref<1x8x128xf32, #tpu.memory_space<vmem>>, vector<1x8x16xf32>,
    %44 = vector.extract_strided_slice %31 {offsets = [0, 54], sizes = [8, 16], strides = [1, 1]} : vector<8x144xf32> to vector<8x16xf32>
    %c0_23 = arith.constant 0 : index
    %c0_24 = arith.constant 0 : index
    %c48 = arith.constant 48 : index
    %45 = vector.load %arg5[%c0_23, %c0_24, %c48] : memref<1x8x128xf32, #tpu.memory_space<vmem>>, vector<1x8x16xf32>
    %46 = vector.shape_cast %45 : vector<1x8x16xf32> to vector<8x16xf32>
    %47 = vector.shape_cast %44 : vector<8x16xf32> to vector<1x8x16xf32>
    tpu.vector_store %arg5[%c0_23, %c0_24, %c48], %47 {strides = array<i32>} : memref<1x8x128xf32, #tpu.memory_space<vmem>>, vector<1x8x16xf32>,
    %48 = vector.extract_strided_slice %31 {offsets = [0, 72], sizes = [8, 16], strides = [1, 1]} : vector<8x144xf32> to vector<8x16xf32>
    %c0_25 = arith.constant 0 : index
    %c0_26 = arith.constant 0 : index
    %c64 = arith.constant 64 : index
    %49 = vector.load %arg5[%c0_25, %c0_26, %c64] : memref<1x8x128xf32, #tpu.memory_space<vmem>>, vector<1x8x16xf32>
    %50 = vector.shape_cast %49 : vector<1x8x16xf32> to vector<8x16xf32>
    %51 = vector.shape_cast %48 : vector<8x16xf32> to vector<1x8x16xf32>
    tpu.vector_store %arg5[%c0_25, %c0_26, %c64], %51 {strides = array<i32>} : memref<1x8x128xf32, #tpu.memory_space<vmem>>, vector<1x8x16xf32>,
    %52 = vector.extract_strided_slice %31 {offsets = [0, 90], sizes = [8, 16], strides = [1, 1]} : vector<8x144xf32> to vector<8x16xf32>
    %c0_27 = arith.constant 0 : index
    %c0_28 = arith.constant 0 : index
    %c80 = arith.constant 80 : index
    %53 = vector.load %arg5[%c0_27, %c0_28, %c80] : memref<1x8x128xf32, #tpu.memory_space<vmem>>, vector<1x8x16xf32>
    %54 = vector.shape_cast %53 : vector<1x8x16xf32> to vector<8x16xf32>
    %55 = vector.shape_cast %52 : vector<8x16xf32> to vector<1x8x16xf32>
    tpu.vector_store %arg5[%c0_27, %c0_28, %c80], %55 {strides = array<i32>} : memref<1x8x128xf32, #tpu.memory_space<vmem>>, vector<1x8x16xf32>,
    %56 = vector.extract_strided_slice %31 {offsets = [0, 108], sizes = [8, 16], strides = [1, 1]} : vector<8x144xf32> to vector<8x16xf32>
    %c0_29 = arith.constant 0 : index
    %c0_30 = arith.constant 0 : index
    %c96 = arith.constant 96 : index
    %57 = vector.load %arg5[%c0_29, %c0_30, %c96] : memref<1x8x128xf32, #tpu.memory_space<vmem>>, vector<1x8x16xf32>
    %58 = vector.shape_cast %57 : vector<1x8x16xf32> to vector<8x16xf32>
    %59 = vector.shape_cast %56 : vector<8x16xf32> to vector<1x8x16xf32>
    tpu.vector_store %arg5[%c0_29, %c0_30, %c96], %59 {strides = array<i32>} : memref<1x8x128xf32, #tpu.memory_space<vmem>>, vector<1x8x16xf32>,
    %60 = vector.extract_strided_slice %31 {offsets = [0, 126], sizes = [8, 16], strides = [1, 1]} : vector<8x144xf32> to vector<8x16xf32>
    %c0_31 = arith.constant 0 : index
    %c0_32 = arith.constant 0 : index
    %c112 = arith.constant 112 : index
    %61 = vector.load %arg5[%c0_31, %c0_32, %c112] : memref<1x8x128xf32, #tpu.memory_space<vmem>>, vector<1x8x16xf32>
    %62 = vector.shape_cast %61 : vector<1x8x16xf32> to vector<8x16xf32>
    %63 = vector.shape_cast %60 : vector<8x16xf32> to vector<1x8x16xf32>
    tpu.vector_store %arg5[%c0_31, %c0_32, %c112], %63 {strides = array<i32>} : memref<1x8x128xf32, #tpu.memory_space<vmem>>, vector<1x8x16xf32>,
    return
  }
  func.func @transform_0(%arg0: i32, %arg1: i32) -> (i32, i32, i32, i32) {
    %c0_i32 = arith.constant 0 : i32
    %c0_i32_0 = arith.constant 0 : i32
    %c0_i32_1 = arith.constant 0 : i32
    return %arg0, %arg1, %c0_i32, %c0_i32_0 : i32, i32, i32, i32
  }
  func.func @transform_1(%arg0: i32, %arg1: i32) -> (i32, i32, i32) {
    %c0_i32 = arith.constant 0 : i32
    %c0_i32_0 = arith.constant 0 : i32
    %c0_i32_1 = arith.constant 0 : i32
    %c0_i32_2 = arith.constant 0 : i32
    return %c0_i32, %c0_i32_0, %c0_i32_1 : i32, i32, i32
  }
  func.func @transform_2(%arg0: i32, %arg1: i32) -> (i32, i32) {
    %c0_i32 = arith.constant 0 : i32
    %c0_i32_0 = arith.constant 0 : i32
    %c0_i32_1 = arith.constant 0 : i32
    return %c0_i32, %c0_i32_0 : i32, i32
  }
  func.func @transform_3(%arg0: i32, %arg1: i32) -> (i32, i32, i32) {
    %c0_i32 = arith.constant 0 : i32
    %c0_i32_0 = arith.constant 0 : i32
    return %arg0, %c0_i32, %arg1 : i32, i32, i32
  }
}

</mosaic_0001>

<bundles_post_ra>
// kernel: bblock_forward.1
= control target key start
LH: loop header
LB: loop body
LE: loop exit
PB: predicated region body
PF: predicated region fallthrough
CT: control target
= control target key end

     0   :  { %s709_s12 = smov 0   ;;  %s711_s13 = smov 0   ;;  %s797_s0 = inlined_call_operand.vmem [shape: bf16[2,2,4,182], index: 0, kind: input, shape index: {}]   ;;  %s798_s1 = inlined_call_operand.vmem [shape: bf16[3,8,12], index: 1, kind: input, shape index: {}]   ;;  %s799_s2 = inlined_call_operand.vmem [shape: f32[8,1], index: 2, kind: input, shape index: {}]   ;;  %s800_s3 = inlined_call_operand.vmem [shape: f32[2,8,256], index: 3, kind: output, shape index: {}]  }
   0x1   :  { %s713_s14 = smov 0   ;;  %s715_s15 = smov 0  }
   0x2   :  { %s717_s16 = smov 0  }
   0x3 LB: > { %s22_s17 = sadd.s32 1, %s667_s14  ;;  %s25_s18 = sadd.s32 1, %s671_s15  ;;  %s675_s16 = sphi %s717_s16, %s13_s16   ;;  %s671_s15 = sphi %s715_s15, %s804_s15   ;;  %s667_s14 = sphi %s713_s14, %s803_s14   ;;  %s663_s13 = sphi %s711_s13, %s802_s13   ;;  %s659_s12 = sphi %s709_s12, %s801_s12  }
   0x4   : > { %p23_p0 = scmp.ge.s32.totalorder %s22_s17, 2  ;;  %p567_p1 = scmp.ge.s32.totalorder %s675_s16, 1 }
   0x5   : > { %p157_p2 = scmp.lt.s32.totalorder %s675_s16, 5 }
   0x6   : > { %s806_s17 = smov (%p23_p0, %s22_s17), 0  ;;  %s808_s18 = smov (!%p23_p0, %s25_s18), %s671_s15 }
   0x7   : > { %p158_p3 = pnand %p567_p1, %p157_p2  ;;  %p27_p4 = scmp.ge.s32.totalorder %s808_s18, 2 }
   0x8   : > { %p188_p5 = scmp.lt.s32.totalorder (!%p158_p3), %s663_s13, 1  ;;  %p190_p6 = scmp.lt.s32.totalorder (!%p158_p3), %s659_s12, 1 }
   0x9   : > { %s810_s18 = smov (%p27_p4, %s808_s18), 0  ;;  %161 = sbr.rel (%p158_p3) target bundleno = 607 (0x25f), region = 32 }
   0xa   : > { %s678_s28 = smov (!%p158_p3), 127   ;;  %s679_s29 = smov (!%p158_p3), 126  }
   0xb   : > { %s681_s30 = smov (!%p158_p3), 110   ;;  %s682_s6 = smov (!%p158_p3), 92  }
   0xc   : > { %s686_s25 = smov (!%p158_p3), 114   ;;  %s687_s26 = smov (!%p158_p3), 120  }
   0xe   : > { %v211_v0 = vlaneseq  ;;  %v677_v1 = vmov 1983009808   ;;  %s812_s13 = smov (!%p188_p5, %s663_s13), 1  ;;  %s814_s12 = smov (!%p190_p6, %s659_s12), 1  ;;  %v680_v12 = vmov 0   ;;  %vm229_vm0 = vcmask 1039360  }
   0xf   : > { %v209_v2 = vunpack.c.l.s4 %v677_v1  ;;  %s569_s19 = sshll.u32 %s812_s13, 2  ;;  %s571_s20 = sshll.u32 %s812_s13, 1  ;;  %304 = vmatprep.mubr.bf16.mxu0 %v680_v12  ;;  %352 = vmatprep.mubr.bf16.mxu1 %v680_v12  ;;  %vm238_vm1 = vcmask 1041408   ;;  %vm236_vm2 = vcmask 1031168   ;;  %vm245_vm3 = vcmask 1043456   ;;  %v421_v26 = vld [vmem:[%s799_s2] sm:$0xff] }
  0x10   : > { %v212_v3 = vshrl.u32 %v211_v0, 7  ;;  %s568_s21 = sshll.u32 %s814_s12, 1  ;;  %s739_s22 = sadd.s32 %s571_s20, %s814_s12  ;;  %635 = vset.pattern.permute.xlu0 %v680_v12  ;;  %vm265_vm4 = vcmask 1045504   ;;  %vm261_vm5 = vcmask 97280   ;;  %v250_v25 = vld [vmem:[%s798_s1] sm:$0xf] }
  0x11   : > { %v210_v4 = vunpack.c.0.s8 %v209_v2  ;;  %s194_s23 = sadd.s32 %s569_s19, %s568_s21  ;;  %vm259_vm6 = vcmask 900096   ;;  %vm367_vm7 = vcmask 752640   ;;  %v573_v32 = vld [vmem:[%s798_s1 + $0x4] sm:$0xf]  ;;  %v578_v36 = vld [vmem:[%s798_s1 + $0x8] sm:$0xf] }
  0x12   : > { %s570_s24 = sshll.u32 %s194_s23, 1  ;;  %s572_s13 = sshll.u32 %s739_s22, 3  ;;  %vm431_vm8 = vcmask 130048   ;;  %vm437_vm9 = vcmask 261248   ;;  %vm442_vm10 = vcmask 392448   ;;  %vm447_vm11 = vcmask 523648  }
  0x13   : > { %v213_v5 = vsub.s32 %v210_v4, %v212_v3  ;;  %s196_s27 = scalar_lea.vmem %s797_s0, %s570_s24  ;;  %s771_s21 = scalar_lea.vmem %s800_s3, %s572_s13  ;;  %vm452_vm12 = vcmask 654848   ;;  %vm457_vm13 = vcmask 786048   ;;  %vm462_vm14 = vcmask 917248  }
  0x14   : > { %v206_v6 = vld [vmem:[%s196_s27] sm:$0xf]  ;;  %s683_s23 = smov 122   ;;  %s684_s22 = smov 118   ;;  %vm469_vm15 = vcmask 932864  }
  0x15   : > { %v216_v7 = vcombine.low %v206_v6, %v206_v6  ;;  %v214_v8 = vrot.slane %v206_v6, %v213_v5  ;;  %s685_s24 = smov 124   ;;  %s688_s27 = smov 116  }
  0x17   : > { %v223_v9 = vrot.slane %v216_v7, %v213_v5  ;;  %v231_v10 = vcombine.low %v214_v8, %v214_v8  ;;  %v215_v15 = vcombine.high %v214_v8, %v214_v8 }
  0x19   : > { %225 = vrot.lane.b32.xlu0 %v223_v9, %s678_s28  ;;  %v224_v11 = vcombine.high %v223_v9, %v223_v9  ;;  %232 = vrot.lane.b32.xlu1 %v231_v10, %s679_s29 }
  0x1d   : > { %227 = vrot.lane.b32.xlu0 %v224_v11, %s678_s28  ;;  %234 = vrot.lane.b32.xlu1 %v214_v8, %s679_s29 }
  0x8b   : > { %v226_v13 = vpop.permute.xlu0 %225  ;;  %v233_v14 = vpop.permute.xlu1 %232 }
  0x8f   : > { %v228_v16 = vpop.permute.xlu0 %227  ;;  %v235_v17 = vpop.permute.xlu1 %234 }
  0x90   : > { %v230_v18 = vsel %vm229_vm0, %v226_v13, %v228_v16  ;;  %v244_v19 = vsel %vm238_vm1, %v215_v15, %v228_v16  ;;  %v237_v20 = vsel %vm236_vm2, %v233_v14, %v235_v17  ;;  %vm472_vm0 = vcmask 1048448  }
  0x91   : > { %v249_v21 = vsel %vm245_vm3, %v244_v19, %v235_v17  ;;  %v241_v22 = vsel %vm238_vm1, %v214_v8, %v230_v18 }
  0x92   : > { %257 = vrot.lane.b32.xlu1 %v249_v21, %s681_s30  ;;  %576 = vmatprep.subr.msk.bf16.mxu1 %vm265_vm4, %v249_v21  ;;  %v247_v23 = vsel %vm245_vm3, %v241_v22, %v237_v20 }
  0x93   : > { %255 = vrot.lane.b32.xlu0 %v247_v23, %s681_s30  ;;  %v316_v24 = vsel %vm265_vm4, %v247_v23, 0 }
  0x94   : > { %335 = vmatpush1.bf16.msra.mxu1 %v316_v24 }
  0x96   : > { %365 = vrot.lane.b32.xlu1 %v249_v21, %s682_s6 }
  0x97   : > { %363 = vrot.lane.b32.xlu0 %v247_v23, %s682_s6  ;;  %577 = vmatmul.mubr.msk.bf16.vlgmr.msra.gmra.mxu1 %vm261_vm5, %v250_v25 }
  0x9b   : > { %424 = vperm.xlu0 %635, %v421_v26  }
 0x104   : > { %v258_v27 = vpop.permute.xlu1 %257 }
 0x105   : > { %v256_v28 = vpop.permute.xlu0 %255  ;;  %574 = vmatprep.subr.msk.bf16.mxu0 %vm265_vm4, %v258_v27 }
 0x106   : > { %v260_v29 = vsel %vm259_vm6, %v256_v28, %v258_v27 }
 0x107   : > { %v267_v30 = vsel %vm265_vm4, %v260_v29, 0 }
 0x108   : > { %287 = vmatpush1.bf16.msra.mxu0 %v267_v30  ;;  %v366_v31 = vpop.permute.xlu1 %365 }
 0x109   : > { %v364_v33 = vpop.permute.xlu0 %363  ;;  %579 = vmatprep.subr.msk.bf16.mxu0 %vm265_vm4, %v366_v31 }
 0x10a   : > { %v368_v34 = vsel %vm367_vm7, %v364_v33, %v366_v31 }
 0x10b   : > { %v373_v35 = vsel %vm265_vm4, %v368_v34, 0  ;;  %575 = vmatmul.mubr.msk.bf16.vlgmr.msra.gmra.mxu0 %vm261_vm5, %v573_v32 }
 0x10c   : > { %393 = vmatpush1.bf16.msra.mxu0 %v373_v35  ;;  %410 = vmatprep.mubr.bf16.mxu0 %v680_v12 }
 0x113   : > { %580 = vmatmul.mubr.msk.bf16.vlgmr.msra.gmra.mxu0 %vm261_vm5, %v578_v36 }
 0x116   : > { %v425_v47 = vpop.permute.xlu0 %424 }
 0x157   : > { %v354_v37 = vpop.f32.mrf.mxu1 }
 0x159   : > { %v356_v38 = vpop.f32.mrf.mxu1 }
 0x15b   : > { %v358_v39 = vpop.f32.mrf.mxu1 }
 0x15d   : > { %v359_v40 = vpop.f32.mrf.mxu1 }
 0x1cb   : > { %v306_v41 = vpop.f32.mrf.mxu0 }
 0x1cc   : > { %v355_v45 = vadd.f32 %v354_v37, %v306_v41 }
 0x1cd   : > { %v308_v42 = vpop.f32.mrf.mxu0 }
 0x1ce   : > { %v357_v54 = vadd.f32 %v356_v38, %v308_v42 }
 0x1cf   : > { %v310_v43 = vpop.f32.mrf.mxu0 }
 0x1d1   : > { %v311_v44 = vpop.f32.mrf.mxu0 }
 0x1d3   : > { %v412_v46 = vpop.f32.mrf.mxu0 }
 0x1d4   : > { %v419_v48 = vadd.f32 %v412_v46, %v355_v45 }
 0x1d5   : > { %v414_v49 = vpop.f32.mrf.mxu0 }
 0x1d6   : > { %v427_v50 = vadd.f32 %v425_v47, %v419_v48  ;;  %v420_v55 = vadd.f32 %v414_v49, %v357_v54 }
 0x1d7   : > { %v416_v51 = vpop.f32.mrf.mxu0 }
 0x1d8   : > { %v429_v52 = vmax.f32 %v427_v50, 0.0  ;;  %v428_v56 = vadd.f32 %v425_v47, %v420_v55 }
 0x1d9   : > { %v417_v53 = vpop.f32.mrf.mxu0 }
 0x1da   : > { %444 = vrot.lane.b32.xlu0 %v429_v52, %s683_s23  ;;  %434 = vrot.lane.b32.xlu1 %v429_v52, %s679_s29  ;;  %432 = vst.msk [vmem:[%s771_s21] sm:$0xff] %vm431_vm8, %v429_v52  ;;  %v430_v57 = vmax.f32 %v428_v56, 0.0 }
 0x1de   : > { %454 = vrot.lane.b32.xlu0 %v429_v52, %s684_s22  ;;  %439 = vrot.lane.b32.xlu1 %v429_v52, %s685_s24 }
 0x1e2   : > { %465 = vrot.lane.b32.xlu0 %v429_v52, %s686_s25  ;;  %449 = vrot.lane.b32.xlu1 %v429_v52, %s687_s26 }
 0x1e6   : > { %459 = vrot.lane.b32.xlu1 %v429_v52, %s688_s27 }
 0x1ea   : > { %467 = vrot.lane.b32.xlu1 %v430_v57, %s686_s25 }
 0x24c   : > { %v435_v58 = vpop.permute.xlu1 %434  ;;  %v445_v59 = vpop.permute.xlu0 %444 }
 0x24d   : > { %438 = vst.msk [vmem:[%s771_s21] sm:$0xff] %vm437_vm9, %v435_v58 }
 0x250   : > { %v440_v60 = vpop.permute.xlu1 %439  ;;  %v455_v62 = vpop.permute.xlu0 %454 }
 0x251   : > { %443 = vst.msk [vmem:[%s771_s21] sm:$0xff] %vm442_vm10, %v440_v60 }
 0x252   : > { %448 = vst.msk [vmem:[%s771_s21] sm:$0xff] %vm447_vm11, %v445_v59 }
 0x254   : > { %v450_v61 = vpop.permute.xlu1 %449  ;;  %v466_v0 = vpop.permute.xlu0 %465 }
 0x255   : > { %453 = vst.msk [vmem:[%s771_s21] sm:$0xff] %vm452_vm12, %v450_v61 }
 0x256   : > { %458 = vst.msk [vmem:[%s771_s21] sm:$0xff] %vm457_vm13, %v455_v62 }
 0x258   : > { %v460_v63 = vpop.permute.xlu1 %459 }
 0x259   : > { %463 = vst.msk [vmem:[%s771_s21] sm:$0xff] %vm462_vm14, %v460_v63 }
 0x25c   : > { %v468_v1 = vpop.permute.xlu1 %467 }
 0x25d   : > { %v470_v2 = vsel %vm469_vm15, %v466_v0, %v468_v1 }
 0x25e   : > { %473 = vst.msk [vmem:[%s771_s21] sm:$0xff] %vm472_vm0, %v470_v2 }
 0x25f PF: > { %s13_s16 = sadd.s32 1, %s675_s16   ;;  %s801_s12 = smov %s667_s14 }
 0x260   : > { %p10_p7 = scmp.ge.s32.totalorder %s13_s16, 6   ;;  %s802_s13 = smov %s671_s15 }
 0x261   : > { %s803_s14 = smov %s806_s17  ;;  %s804_s15 = smov %s810_s18 }
 0x262   :  { %12 = sbr.rel (!%p10_p7) target bundleno = 3 (0x3), region = 64 }

</bundles_post_ra>
